<compile_context>
chip_gen: v7x
topology: tpu7x:2x2x1
jax: 0.10.0
libtpu: 0.0.40
codegen_flags: <defaults>
</compile_context>

<pallas_src>
import functools

import jax
import jax.numpy as jnp
import numpy as np
from jax.experimental import pallas as pl
from jax.experimental.pallas import tpu as pltpu


# ----------------------------- Pallas kernel --------------------------------
def _fnnkt_kernel(s_ref, w1aug_ref, wrest_ref, ball_ref, wg_ref, bg_ref,
                  o_ref, *, n_layer):
    # s block: (1, TN, dim+1).  Everything below is feature-major: h is
    # (features, TN), so the N-sample axis sits on the 128 lanes.
    x_blk = s_ref[0]                                           # (TN, dim+1)

    # First layer: w1aug has a zero column for the t entry, so contracting the
    # full (dim+1)-wide block is exactly W1^T @ x (no in-kernel lane slice).
    h = jnp.maximum(
        jnp.dot(w1aug_ref[...], x_blk.T, preferred_element_type=jnp.float32)
        + ball_ref[:, 0:1], 0.0)                               # (H, TN)
    for i in range(1, n_layer):
        h = jnp.maximum(
            jnp.dot(wrest_ref[i - 1], h, preferred_element_type=jnp.float32)
            + ball_ref[:, i:i + 1], 0.0)

    # Output projection with the per-batch pre-folded Gaussian weight/bias
    # (g(t), bout and 1/correct already folded in the wrapper).
    o_ref[0] = (jnp.dot(wg_ref[0], h, preferred_element_type=jnp.float32)
                + bg_ref[0]).astype(o_ref.dtype)               # (dim, TN)


# ------------------------------- wrapper -------------------------------------
def fnnkt_forward(s, params, *, n_layer, correct=1.0, lane_tile=None):
    B, N, dimp1 = s.shape
    dim = dimp1 - 1
    H = params["w1"].shape[1]
    O = params["center"].shape[0]

    # --- per-batch Gaussian-kernel fold (hoisted out of the kernel) ----------
    t = s[:, 0, 0].astype(jnp.float32)                                  # (B,)
    g = jnp.exp(-jnp.square((t[:, None] - params["center"][None, :])
                            / params["width"][None, :]))                # (B, O)
    wout3 = params["wout"].reshape(H, dim, O)                           # [h,k,l]
    wg_all = jnp.einsum("bl,hkl->bkh", g, wout3) * (1.0 / correct)      # (B,dim,H)
    bg_all = (jnp.einsum("bl,kl->bk", g, params["bout"].reshape(dim, O))
              * (1.0 / correct))[:, :, None]                            # (B,dim,1)

    # --- weights packed into a few resident VMEM blocks ----------------------
    w1aug = jnp.concatenate(
        [jnp.zeros((H, 1), jnp.float32), params["w1"].T], axis=1)       # (H,dim+1)
    if n_layer > 1:
        w_rest = jnp.stack([params[f"w{i + 1}"].T
                            for i in range(1, n_layer)])                # (L-1,H,H)
    else:
        w_rest = jnp.zeros((1, H, H), jnp.float32)                      # unread dummy
    b_all = jnp.stack([params[f"b{i + 1}"]
                       for i in range(n_layer)], axis=1)                # (H, L)

    # --- lane tile: largest 128-multiple dividing N; keep >= 2 grid units ----
    if lane_tile is None:
        lane_tile = next((tn for tn in (2048, 1024, 512, 256, 128)
                          if N % tn == 0), N)
        # v7x has two TensorCores: make sure the parallel grid has >= 2 units.
        while B * (N // lane_tile) < 2 and lane_tile % 256 == 0:
            lane_tile //= 2
    grid = (B, N // lane_tile)

    const2 = lambda b, r: (0, 0)
    const3 = lambda b, r: (0, 0, 0)

    kernel = functools.partial(_fnnkt_kernel, n_layer=n_layer)
    out_t = pl.pallas_call(
        kernel,
        out_shape=jax.ShapeDtypeStruct((B, dim, N), s.dtype),
        grid=grid,
        in_specs=[
            pl.BlockSpec((1, lane_tile, dimp1), lambda b, r: (b, r, 0)),
            pl.BlockSpec(w1aug.shape, const2),          # resident weights
            pl.BlockSpec(w_rest.shape, const3),
            pl.BlockSpec(b_all.shape, const2),
            pl.BlockSpec((1, dim, H), lambda b, r: (b, 0, 0)),
            pl.BlockSpec((1, dim, 1), lambda b, r: (b, 0, 0)),
        ],
        out_specs=pl.BlockSpec((1, dim, lane_tile), lambda b, r: (b, 0, r)),
        compiler_params=pltpu.CompilerParams(
            dimension_semantics=("parallel", "parallel")),
    )(s, w1aug, w_rest, b_all, wg_all, bg_all)

    # Back to the module's (B, N, dim) layout (layout plumbing only).
    return jnp.transpose(out_t, (0, 2, 1))


# ------------------------- pure-JAX reference --------------------------------
def fnnkt_reference(s, params, *, n_layer, correct=1.0):
    t = s[:, 0, 0]
    x = s[:, :, 1:]
    for i in range(n_layer):
        x = jnp.maximum(x @ params[f"w{i + 1}"] + params[f"b{i + 1}"], 0.0)
    y = x @ params["wout"] + params["bout"]
    B, N = y.shape[0], y.shape[1]
    dim = s.shape[-1] - 1
    O = params["center"].shape[0]
    y = y.reshape(B, N, dim, O)
    g = jnp.exp(-jnp.square(
        (t[:, None] - params["center"][None, :]) / params["width"][None, :]))
    return jnp.einsum("ijkl,il->ijk", y, g) / correct


# ------------------------- deterministic params -------------------------------
def init_params(key, *, dim, n_hidden, n_layer, n_output, t_init, t_fin):
    params = {}
    in_dim = dim
    for i in range(n_layer):
        key, kw, kb = jax.random.split(key, 3)
        bound = 1.0 / np.sqrt(in_dim)
        params[f"w{i + 1}"] = jax.random.uniform(
            kw, (in_dim, n_hidden), jnp.float32, -bound, bound)
        params[f"b{i + 1}"] = jax.random.uniform(
            kb, (n_hidden,), jnp.float32, -bound, bound)
        in_dim = n_hidden
    key, kw, kb = jax.random.split(key, 3)
    bound = 1.0 / np.sqrt(n_hidden)
    params["wout"] = jax.random.uniform(
        kw, (n_hidden, dim * n_output), jnp.float32, -bound, bound)
    params["bout"] = jax.random.uniform(
        kb, (dim * n_output,), jnp.float32, -bound, bound)
    params["center"] = jnp.linspace(t_init, t_fin, n_output).astype(jnp.float32)
    params["width"] = jnp.full((n_output,), (t_fin - t_init) / n_output,
                               jnp.float32)
    return params


if __name__ == "__main__":
    # "param" hyperparameters of the PyTorch module, chosen small.
    dim, n_hidden, n_layer, n_output = 2, 32, 3, 8
    t_init, t_fin = 0.0, 1.0
    B, N = 2, 256          # N a multiple of 128 so lane tiles are dense
    correct = 1.0

    key = jax.random.PRNGKey(0)
    key, ks = jax.random.split(key)
    params = init_params(key, dim=dim, n_hidden=n_hidden, n_layer=n_layer,
                         n_output=n_output, t_init=t_init, t_fin=t_fin)

    # s = (t, x): same t in column 0 for every point of a batch element.
    t_vals = jax.random.uniform(ks, (B,), jnp.float32, t_init, t_fin)
    key, kx = jax.random.split(key)
    x_vals = jax.random.normal(kx, (B, N, dim), jnp.float32)
    s = jnp.concatenate(
        [jnp.broadcast_to(t_vals[:, None, None], (B, N, 1)), x_vals], axis=-1)

    out = fnnkt_forward(s, params, n_layer=n_layer, correct=correct)
    out = jax.block_until_ready(out)

    ref = fnnkt_reference(s, params, n_layer=n_layer, correct=correct)
    np.testing.assert_allclose(np.asarray(out), np.asarray(ref),
                               rtol=1e-4, atol=1e-5)
    print("KERNEL_OK")
</pallas_src>

<mosaic_0001>
module attributes {stable_mosaic.version = 11 : i64} {
  func.func @_fnnkt_kernel(%arg0: i32, %arg1: i32, %arg2: memref<1x256x3xf32, #tpu.memory_space<vmem>>, %arg3: memref<32x3xf32, #tpu.memory_space<vmem>>, %arg4: memref<2x32x32xf32, #tpu.memory_space<vmem>>, %arg5: memref<32x3xf32, #tpu.memory_space<vmem>>, %arg6: memref<1x2x32xf32, #tpu.memory_space<vmem>>, %arg7: memref<1x2x1xf32, #tpu.memory_space<vmem>>, %arg8: memref<1x2x256xf32, #tpu.memory_space<vmem>>) attributes {dimension_semantics = [#tpu.dimension_semantics<parallel>, #tpu.dimension_semantics<parallel>], iteration_bounds = array<i64: 2, 1>, scalar_prefetch = 0 : i64, scratch_operands = 0 : i64, tpu.core_type = #tpu.core_type<tc>, window_params = [{transform_indices = @transform_0, window_bounds = array<i64: 1, 256, 3>}, {pipeline_mode = #tpu.pipeline_mode<synchronous>, transform_indices = @transform_1, window_bounds = array<i64: 32, 3>}, {pipeline_mode = #tpu.pipeline_mode<synchronous>, transform_indices = @transform_2, window_bounds = array<i64: 2, 32, 32>}, {pipeline_mode = #tpu.pipeline_mode<synchronous>, transform_indices = @transform_3, window_bounds = array<i64: 32, 3>}, {transform_indices = @transform_4, window_bounds = array<i64: 1, 2, 32>}, {transform_indices = @transform_5, window_bounds = array<i64: 1, 2, 1>}, {transform_indices = @transform_6, window_bounds = array<i64: 1, 2, 256>}]} {
    %c0 = arith.constant 0 : index
    %c0_0 = arith.constant 0 : index
    %c0_1 = arith.constant 0 : index
    %0 = vector.load %arg2[%c0, %c0_0, %c0_1] : memref<1x256x3xf32, #tpu.memory_space<vmem>>, vector<1x256x3xf32>
    %1 = vector.shape_cast %0 : vector<1x256x3xf32> to vector<256x3xf32>
    %c0_2 = arith.constant 0 : index
    %c0_3 = arith.constant 0 : index
    %2 = vector.load %arg3[%c0_2, %c0_3] : memref<32x3xf32, #tpu.memory_space<vmem>>, vector<32x3xf32>
    %3 = tpu.transpose %1, [1, 0] : vector<256x3xf32> -> vector<3x256xf32>
    %cst = arith.constant dense<0.000000e+00> : vector<32x256xf32>
    %4 = tpu.matmul %2, %3, %cst {dimension_numbers = #tpu.dot_dimension_numbers<[1], [0], [0], [1], [0, 0, 1, 1], [], []>} : vector<32x3xf32>, vector<3x256xf32>, vector<32x256xf32> -> vector<32x256xf32>
    %c0_4 = arith.constant 0 : index
    %c0_5 = arith.constant 0 : index
    %5 = vector.load %arg5[%c0_4, %c0_5] : memref<32x3xf32, #tpu.memory_space<vmem>>, vector<32x1xf32>
    %6 = vector.broadcast %5 : vector<32x1xf32> to vector<32x256xf32>
    %7 = arith.addf %4, %6 : vector<32x256xf32>
    %cst_6 = arith.constant 0.000000e+00 : f32
    %8 = vector.broadcast %cst_6 : f32 to vector<32x256xf32>
    %9 = arith.maximumf %7, %8 : vector<32x256xf32>
    %c0_7 = arith.constant 0 : index
    %c0_8 = arith.constant 0 : index
    %c0_9 = arith.constant 0 : index
    %10 = vector.load %arg4[%c0_7, %c0_8, %c0_9] : memref<2x32x32xf32, #tpu.memory_space<vmem>>, vector<1x32x32xf32>
    %11 = vector.shape_cast %10 : vector<1x32x32xf32> to vector<32x32xf32>
    %cst_10 = arith.constant dense<0.000000e+00> : vector<32x256xf32>
    %12 = tpu.matmul %11, %9, %cst_10 {dimension_numbers = #tpu.dot_dimension_numbers<[1], [0], [0], [1], [0, 0, 1, 1], [], []>} : vector<32x32xf32>, vector<32x256xf32>, vector<32x256xf32> -> vector<32x256xf32>
    %c0_11 = arith.constant 0 : index
    %c1 = arith.constant 1 : index
    %13 = vector.load %arg5[%c0_11, %c1] : memref<32x3xf32, #tpu.memory_space<vmem>>, vector<32x1xf32>
    %14 = vector.broadcast %13 : vector<32x1xf32> to vector<32x256xf32>
    %15 = arith.addf %12, %14 : vector<32x256xf32>
    %cst_12 = arith.constant 0.000000e+00 : f32
    %16 = vector.broadcast %cst_12 : f32 to vector<32x256xf32>
    %17 = arith.maximumf %15, %16 : vector<32x256xf32>
    %c1_13 = arith.constant 1 : index
    %c0_14 = arith.constant 0 : index
    %c0_15 = arith.constant 0 : index
    %18 = vector.load %arg4[%c1_13, %c0_14, %c0_15] : memref<2x32x32xf32, #tpu.memory_space<vmem>>, vector<1x32x32xf32>
    %19 = vector.shape_cast %18 : vector<1x32x32xf32> to vector<32x32xf32>
    %cst_16 = arith.constant dense<0.000000e+00> : vector<32x256xf32>
    %20 = tpu.matmul %19, %17, %cst_16 {dimension_numbers = #tpu.dot_dimension_numbers<[1], [0], [0], [1], [0, 0, 1, 1], [], []>} : vector<32x32xf32>, vector<32x256xf32>, vector<32x256xf32> -> vector<32x256xf32>
    %c0_17 = arith.constant 0 : index
    %c2 = arith.constant 2 : index
    %21 = vector.load %arg5[%c0_17, %c2] : memref<32x3xf32, #tpu.memory_space<vmem>>, vector<32x1xf32>
    %22 = vector.broadcast %21 : vector<32x1xf32> to vector<32x256xf32>
    %23 = arith.addf %20, %22 : vector<32x256xf32>
    %cst_18 = arith.constant 0.000000e+00 : f32
    %24 = vector.broadcast %cst_18 : f32 to vector<32x256xf32>
    %25 = arith.maximumf %23, %24 : vector<32x256xf32>
    %c0_19 = arith.constant 0 : index
    %c0_20 = arith.constant 0 : index
    %c0_21 = arith.constant 0 : index
    %26 = vector.load %arg6[%c0_19, %c0_20, %c0_21] : memref<1x2x32xf32, #tpu.memory_space<vmem>>, vector<1x2x32xf32>
    %27 = vector.shape_cast %26 : vector<1x2x32xf32> to vector<2x32xf32>
    %cst_22 = arith.constant dense<0.000000e+00> : vector<2x256xf32>
    %28 = tpu.matmul %27, %25, %cst_22 {dimension_numbers = #tpu.dot_dimension_numbers<[1], [0], [0], [1], [0, 0, 1, 1], [], []>} : vector<2x32xf32>, vector<32x256xf32>, vector<2x256xf32> -> vector<2x256xf32>
    %c0_23 = arith.constant 0 : index
    %c0_24 = arith.constant 0 : index
    %c0_25 = arith.constant 0 : index
    %29 = vector.load %arg7[%c0_23, %c0_24, %c0_25] : memref<1x2x1xf32, #tpu.memory_space<vmem>>, vector<1x2x1xf32>
    %30 = vector.shape_cast %29 : vector<1x2x1xf32> to vector<2x1xf32>
    %31 = vector.broadcast %30 : vector<2x1xf32> to vector<2x256xf32>
    %32 = arith.addf %28, %31 : vector<2x256xf32>
    %c0_26 = arith.constant 0 : index
    %c0_27 = arith.constant 0 : index
    %c0_28 = arith.constant 0 : index
    %33 = vector.load %arg8[%c0_26, %c0_27, %c0_28] : memref<1x2x256xf32, #tpu.memory_space<vmem>>, vector<1x2x256xf32>
    %34 = vector.shape_cast %33 : vector<1x2x256xf32> to vector<2x256xf32>
    %35 = vector.shape_cast %32 : vector<2x256xf32> to vector<1x2x256xf32>
    tpu.vector_store %arg8[%c0_26, %c0_27, %c0_28], %35 {strides = array<i32>} : memref<1x2x256xf32, #tpu.memory_space<vmem>>, vector<1x2x256xf32>,
    return
  }
  func.func @transform_0(%arg0: i32, %arg1: i32) -> (i32, i32, i32) {
    %c0_i32 = arith.constant 0 : i32
    %c0_i32_0 = arith.constant 0 : i32
    return %arg0, %arg1, %c0_i32 : i32, i32, i32
  }
  func.func @transform_1(%arg0: i32, %arg1: i32) -> (i32, i32) {
    %c0_i32 = arith.constant 0 : i32
    %c0_i32_0 = arith.constant 0 : i32
    %c0_i32_1 = arith.constant 0 : i32
    return %c0_i32, %c0_i32_0 : i32, i32
  }
  func.func @transform_2(%arg0: i32, %arg1: i32) -> (i32, i32, i32) {
    %c0_i32 = arith.constant 0 : i32
    %c0_i32_0 = arith.constant 0 : i32
    %c0_i32_1 = arith.constant 0 : i32
    %c0_i32_2 = arith.constant 0 : i32
    return %c0_i32, %c0_i32_0, %c0_i32_1 : i32, i32, i32
  }
  func.func @transform_3(%arg0: i32, %arg1: i32) -> (i32, i32) {
    %c0_i32 = arith.constant 0 : i32
    %c0_i32_0 = arith.constant 0 : i32
    %c0_i32_1 = arith.constant 0 : i32
    return %c0_i32, %c0_i32_0 : i32, i32
  }
  func.func @transform_4(%arg0: i32, %arg1: i32) -> (i32, i32, i32) {
    %c0_i32 = arith.constant 0 : i32
    %c0_i32_0 = arith.constant 0 : i32
    %c0_i32_1 = arith.constant 0 : i32
    return %arg0, %c0_i32, %c0_i32_0 : i32, i32, i32
  }
  func.func @transform_5(%arg0: i32, %arg1: i32) -> (i32, i32, i32) {
    %c0_i32 = arith.constant 0 : i32
    %c0_i32_0 = arith.constant 0 : i32
    %c0_i32_1 = arith.constant 0 : i32
    return %arg0, %c0_i32, %c0_i32_0 : i32, i32, i32
  }
  func.func @transform_6(%arg0: i32, %arg1: i32) -> (i32, i32, i32) {
    %c0_i32 = arith.constant 0 : i32
    %c0_i32_0 = arith.constant 0 : i32
    return %arg0, %c0_i32, %arg1 : i32, i32, i32
  }
}

</mosaic_0001>

<bundles_post_ra>
// kernel: tpu_custom_call.1
= control target key start
LH: loop header
LB: loop body
LE: loop exit
PB: predicated region body
PF: predicated region fallthrough
CT: control target
= control target key end

     0   :  { %11 = vsyncpa [#allocation3], 0  ;;  %s1715_s0 = inlined_call_operand.vmem [shape: f32[2,256,3], index: 0, kind: input, shape index: {}]   ;;  %s1716_s1 = inlined_call_operand.vmem [shape: f32[32,3], index: 1, kind: input, shape index: {}]   ;;  %s1717_s2 = inlined_call_operand.vmem [shape: f32[2,32,32], index: 2, kind: input, shape index: {}]   ;;  %s1718_s3 = inlined_call_operand.vmem [shape: f32[32,3], index: 3, kind: input, shape index: {}]   ;;  %s1719_s4 = inlined_call_operand.vmem [shape: f32[2,2,32], index: 4, kind: input, shape index: {}]   ;;  %s1720_s5 = inlined_call_operand.vmem [shape: f32[2,2,1], index: 5, kind: input, shape index: {}]   ;;  %s1721_s6 = inlined_call_operand.hbm [shape: f32[2,2,256], index: 6, kind: output, shape index: {}]  }
   0x1   :  { %13 = vsyncpa [#allocation3 + $0x1], 0  ;;  %s1416_s21 = smov 0   ;;  %s1418_s22 = smov 0  }
   0x2   :  { %s1420_s23 = smov 0   ;;  %s1422_s24 = smov 0  }
   0x3   :  { %s1424_s25 = smov 0   ;;  %s1426_s26 = smov 0  }
   0x4 LB: > { %s1051_s27 = sadd.s32 4294967295, %s1374_s26   ;;  %s1052_s28 = sadd.s32 4294967294, %s1374_s26   ;;  %s1374_s26 = sphi %s1426_s26, %s19_s26   ;;  %s1370_s25 = sphi %s1424_s25, %s1730_s25   ;;  %s1366_s24 = sphi %s1422_s24, %s1729_s24   ;;  %s1362_s23 = sphi %s1420_s23, %s1728_s23   ;;  %s1358_s22 = sphi %s1418_s22, %s1727_s22   ;;  %s1354_s21 = sphi %s1416_s21, %s1726_s21  }
   0x5   : > { %s31_s29 = sadd.s32 1, %s1370_s25  ;;  %s183_s30 = sadd.s32 1, %s1362_s23 }
   0x6   : > { %p33_p0 = scmp.ge.s32.totalorder %s31_s29, 2  ;;  %p193_p1 = scmp.ne.s32.totalorder %s1362_s23, %s1358_s22 }
   0x7   : > { %p194_p2 = scmp.eq.s32.totalorder %s1051_s27, 1  ;;  %p199_p3 = scmp.ne.s32.totalorder %s1358_s22, %s1354_s21 }
   0x8   : > { %s1732_s29 = smov (%p33_p0, %s31_s29), 0  ;;  %p200_p5 = scmp.eq.s32.totalorder %s1052_s28, 1 }
   0x9   : > { %p1456_p4 = por %p194_p2, %p193_p1  ;;  %s178_s8 = ssub.s32 %s1370_s25, %s1732_s29 }
   0xa   : > { %p1055_p6 = scmp.ge.s32.totalorder %s1374_s26, 1  ;;  %p181_p7 = scmp.eq.s32.totalorder %s178_s8, 0 }
   0xb   : > { %p1463_p8 = por %p200_p5, %p199_p3  ;;  %p254_p9 = scmp.lt.s32.totalorder %s1374_s26, 3 }
   0xc   : > { %s1469_s10 = scalar_select %p181_p7, %s1362_s23, %s183_s30  }
   0xd   : > { %p255_p10 = pnand %p1055_p6, %p254_p9 }
   0xe   : > { %p297_p11 = scmp.lt.s32.totalorder (!%p255_p10), %s1366_s24, 1  ;;  %vm375_vm0 = vcmask (!%p255_p10), 23552   ;;  %v1475_v0 = vld [vmem:[%s1716_s1] sm:$0xff] (!%p255_p10)  ;;  %v1376_v1 = vmov (!%p255_p10), 0   ;;  %v1493_v3 = vld [vmem:[%s1718_s3 + $0x10] sm:$0xff] (!%p255_p10)  ;;  %v1498_v4 = vld [vmem:[%s1718_s3 + $0x8] sm:$0xff] (!%p255_p10) }
   0xf   : > { %258 = sbr.rel (%p255_p10) target bundleno = 1029 (0x405), region = 44  ;;  %1150 = vmatprep.mubr.msk.f32.mxu0 (!%p255_p10), %vm375_vm0, %v1475_v0  ;;  %1289 = vset.pattern.permute.xlu0 (!%p255_p10), %v1376_v1  ;;  %v1483_v2 = vld [vmem:[%s1718_s3] sm:$0xff] (!%p255_p10)  ;;  %v1505_v5 = vld [vmem:[%s1718_s3 + $0x18] sm:$0xff] (!%p255_p10)  ;;  %vm1514_vm1 = vmpackc.low (!%p255_p10), %vm375_vm0, %vm375_vm0  ;;  %v1377_v58 = vmov (!%p255_p10), 0.0   ;;  %v1378_v59 = vmov (!%p255_p10), 1   ;;  %vm601_vm2 = vcmask (!%p255_p10), 261120  }
  0x10   : > { %357 = vperm.xlu0 (!%p255_p10), %1289, %v1483_v2   ;;  %1290 = vset.pattern.permute.xlu1 (!%p255_p10), %v1376_v1  ;;  %v348_v55 = vld [vmem:[%s1716_s1 + $0x8] sm:$0xff] (!%p255_p10)  ;;  %v349_v56 = vld [vmem:[%s1716_s1 + $0x10] sm:$0xff] (!%p255_p10)  ;;  %v350_v57 = vld [vmem:[%s1716_s1 + $0x18] sm:$0xff] (!%p255_p10)  ;;  %s293_s16 = sand.u32 (!%p255_p10), 1, %s1358_s22   ;;  %s1117_s18 = sshll.u32 (!%p255_p10), %s1366_s24, 6 }
  0x11   : > { %367 = vperm.xlu1 (!%p255_p10), %1290, %v1493_v3   ;;  %678 = vmatprep.mubr.f32.mxu1 (!%p255_p10), %v1377_v58  ;;  %s1056_s17 = sshll.u32 (!%p255_p10), %s293_s16, 2  ;;  %s935_s30 = scalar_lea.sflag (!%p255_p10), [#allocation3], %s293_s16 }
  0x12   : > { %s295_s19 = scalar_lea.vmem (!%p255_p10), [#allocation2], %s1056_s17 }
  0x14   : > { %362 = vperm.xlu0 (!%p255_p10), %1289, %v1498_v4  }
  0x15   : > { %372 = vperm.xlu1 (!%p255_p10), %1290, %v1505_v5  }
  0x16   : > { %s1486_s15 = scalar_select %p297_p11, %s1366_s24, 1 }
  0x17   : > { %s1380_s24 = smov [#allocation2]  }
  0x18   : > { %s1116_s20 = sshll.u32 %s1486_s15, 8  ;;  %1291 = vset.pattern.permute.xlu0 %v1378_v59  ;;  %s1059_s28 = sshll.u32 %s1486_s15, 1 }
  0x19   : > { %s1510_s11 = scalar_lea.vmem %s1715_s0, %s1116_s20  ;;  %1292 = vset.pattern.permute.xlu1 %v1378_v59  ;;  %586 = vperm.xlu0 %1291, %v1483_v2   ;;  %s309_s14 = scalar_lea.vmem %s1719_s4, %s1059_s28 }
  0x1a   : > { %v331_v7 = vld [vmem:[%s1510_s11 + $0x80] sm:$0xff]  ;;  %v332_v8 = vld [vmem:[%s1510_s11 + $0x88] sm:$0xff]  ;;  %v333_v12 = vld [vmem:[%s1510_s11 + $0x90] sm:$0xff]  ;;  %590 = vperm.xlu1 %1292, %v1498_v4   ;;  %s951_s20 = sshll.u32 %s295_s19, 4  ;;  %s1670_s20 = int_to_ptr.vmem [resolvable:$true] %s951_s20 }
  0x1b   : > { %v315_v9 = vld [vmem:[%s1510_s11] sm:$0xff]  ;;  %v1158_v10 = vpack.c.bf16 %v332_v8, %v331_v7  ;;  %v316_v11 = vld [vmem:[%s1510_s11 + $0x8] sm:$0xff]  ;;  %v334_v13 = vld [vmem:[%s1510_s11 + $0x98] sm:$0xff]  ;;  %s1296_s8 = scalar_lea.vmem %s1670_s20, 64 }
  0x1c   : > { %v1161_v14 = vpack.c.bf16 %v316_v11, %v315_v9  ;;  %v1164_v15 = vpack.c.bf16 %v334_v13, %v333_v12  ;;  %v317_v16 = vld [vmem:[%s1510_s11 + $0x10] sm:$0xff]  ;;  %v318_v17 = vld [vmem:[%s1510_s11 + $0x18] sm:$0xff]  ;;  %v335_v18 = vld [vmem:[%s1510_s11 + $0xa0] sm:$0xff]  ;;  %p1297_p12 = scmp.ne.s32.totalorder %s1670_s20, %s1296_s8 }
  0x1d   : > { %1160 = vmatprep.subr.msk.bf16.mxu0 %vm1514_vm1, %v1158_v10  ;;  %v336_v19 = vld [vmem:[%s1510_s11 + $0xa8] sm:$0xff]  ;;  %v1167_v20 = vpack.c.bf16 %v318_v17, %v317_v16  ;;  %v319_v22 = vld [vmem:[%s1510_s11 + $0x20] sm:$0xff]  ;;  %v337_v24 = vld [vmem:[%s1510_s11 + $0xb0] sm:$0xff]  ;;  %598 = vperm.xlu0 %1291, %v1505_v5  }
  0x1e   : > { %1163 = vmatpush3.bf16.xpose.msk.msra.mxu0 %vm1514_vm1, %v1161_v14  ;;  %v1170_v21 = vpack.c.bf16 %v336_v19, %v335_v18  ;;  %v320_v23 = vld [vmem:[%s1510_s11 + $0x28] sm:$0xff]  ;;  %v338_v25 = vld [vmem:[%s1510_s11 + $0xb8] sm:$0xff]  ;;  %v321_v28 = vld [vmem:[%s1510_s11 + $0x30] sm:$0xff]  ;;  %594 = vperm.xlu1 %1292, %v1493_v3   ;;  %p1298_p13 = pnand %p1297_p12, %p1456_p4 }
  0x1f   : > { %1166 = vmatprep.subr.msk.bf16.mxu0 %vm1514_vm1, %v1164_v15  ;;  %v1173_v26 = vpack.c.bf16 %v320_v23, %v319_v22  ;;  %v1176_v27 = vpack.c.bf16 %v338_v25, %v337_v24  ;;  %v322_v29 = vld [vmem:[%s1510_s11 + $0x38] sm:$0xff]  ;;  %v339_v30 = vld [vmem:[%s1510_s11 + $0xc0] sm:$0xff]  ;;  %v340_v31 = vld [vmem:[%s1510_s11 + $0xc8] sm:$0xff] }
  0x20   : > { %v1179_v32 = vpack.c.bf16 %v322_v29, %v321_v28  ;;  %v1182_v33 = vpack.c.bf16 %v340_v31, %v339_v30  ;;  %v323_v34 = vld [vmem:[%s1510_s11 + $0x40] sm:$0xff]  ;;  %v324_v35 = vld [vmem:[%s1510_s11 + $0x48] sm:$0xff]  ;;  %v341_v36 = vld [vmem:[%s1510_s11 + $0xd0] sm:$0xff]  ;;  %p1299_p0 = pneg %p1298_p13 }
  0x21   : > { %v342_v37 = vld [vmem:[%s1510_s11 + $0xd8] sm:$0xff]  ;;  %v1185_v38 = vpack.c.bf16 %v324_v35, %v323_v34  ;;  %v325_v40 = vld [vmem:[%s1510_s11 + $0x50] sm:$0xff]  ;;  %v343_v42 = vld [vmem:[%s1510_s11 + $0xe0] sm:$0xff] }
  0x22   : > { %v1188_v39 = vpack.c.bf16 %v342_v37, %v341_v36  ;;  %v326_v41 = vld [vmem:[%s1510_s11 + $0x58] sm:$0xff]  ;;  %v344_v43 = vld [vmem:[%s1510_s11 + $0xe8] sm:$0xff]  ;;  %v327_v46 = vld [vmem:[%s1510_s11 + $0x60] sm:$0xff]  ;;  %v1379_v37 = vmov 2  }
  0x23   : > { %v1191_v44 = vpack.c.bf16 %v326_v41, %v325_v40  ;;  %v1194_v45 = vpack.c.bf16 %v344_v43, %v343_v42  ;;  %v328_v47 = vld [vmem:[%s1510_s11 + $0x68] sm:$0xff]  ;;  %v345_v48 = vld [vmem:[%s1510_s11 + $0xf0] sm:$0xff]  ;;  %v346_v49 = vld [vmem:[%s1510_s11 + $0xf8] sm:$0xff]  ;;  %1293 = vset.pattern.permute.xlu1 %v1379_v37  ;;  %1294 = vset.pattern.permute.xlu0 %v1379_v37 }
  0x24   : > { %v1197_v50 = vpack.c.bf16 %v328_v47, %v327_v46  ;;  %v1200_v51 = vpack.c.bf16 %v346_v49, %v345_v48  ;;  %v329_v52 = vld [vmem:[%s1510_s11 + $0x70] sm:$0xff]  ;;  %v330_v53 = vld [vmem:[%s1510_s11 + $0x78] sm:$0xff]  ;;  %v582_v34 = vld [vmem:[%s1717_s2 + $0x8] sm:$0xff]  ;;  %717 = vperm.xlu1 %1293, %v1483_v2   ;;  %721 = vperm.xlu0 %1294, %v1498_v4   ;;  %s313_s11 = scalar_lea.vmem %s1720_s5, %s1059_s28  ;;  %s1668_s28 = scalar_lea.hbm %s1721_s6, %s1117_s18 }
  0x25   : > { %v1203_v54 = vpack.c.bf16 %v330_v53, %v329_v52  ;;  %v583_v35 = vld [vmem:[%s1717_s2 + $0x10] sm:$0xff]  ;;  %v584_v36 = vld [vmem:[%s1717_s2 + $0x18] sm:$0xff] }
  0x26   : > { %1169 = vmatpush3.bf16.xpose.msk.msra.mxu0 %vm1514_vm1, %v1167_v20 }
  0x27   : > { %1172 = vmatprep.subr.msk.bf16.mxu0 %vm1514_vm1, %v1170_v21 }
  0x28   : > { %725 = vperm.xlu1 %1293, %v1493_v3   ;;  %1295 = vset.pattern.permute.xlu0 %v1376_v1 }
  0x2c   : > { %729 = vperm.xlu1 %1293, %v1505_v5  }
  0x2e   : > { %1175 = vmatpush3.bf16.xpose.msk.msra.mxu0 %vm1514_vm1, %v1173_v26 }
  0x2f   : > { %1178 = vmatprep.subr.msk.bf16.mxu0 %vm1514_vm1, %v1176_v27 }
  0x36   : > { %1181 = vmatpush3.bf16.xpose.msk.msra.mxu0 %vm1514_vm1, %v1179_v32 }
  0x37   : > { %1184 = vmatprep.subr.msk.bf16.mxu0 %vm1514_vm1, %v1182_v33  ;;  %v581_v33 = vld [vmem:[%s1717_s2] sm:$0xff] }
  0x3e   : > { %1187 = vmatpush3.bf16.xpose.msk.msra.mxu0 %vm1514_vm1, %v1185_v38 }
  0x3f   : > { %1190 = vmatprep.subr.msk.bf16.mxu0 %vm1514_vm1, %v1188_v39 }
  0x46   : > { %1193 = vmatpush3.bf16.xpose.msk.msra.mxu0 %vm1514_vm1, %v1191_v44 }
  0x47   : > { %1196 = vmatprep.subr.msk.bf16.mxu0 %vm1514_vm1, %v1194_v45 }
  0x4e   : > { %1199 = vmatpush3.bf16.xpose.msk.msra.mxu0 %vm1514_vm1, %v1197_v50 }
  0x4f   : > { %1202 = vmatprep.subr.msk.bf16.mxu0 %vm1514_vm1, %v1200_v51 }
  0x56   : > { %1205 = vmatpush3.bf16.xpose.msk.msra.mxu0 %vm1514_vm1, %v1203_v54 }
  0x5d   : > { %1151 = vmatmul.mubr.msk.f32.vlgmr.msra.gmra.mrb[0].mxu0 %vm375_vm0, %v1475_v0 }
  0x5e   : > { %1152 = vmatprep.mubr.msk.f32.mxu0 %vm375_vm0, %v348_v55 }
  0x61   : > { %1153 = vmatmul.mubr.msk.f32.gmra.mrb[2].mxu0 %vm375_vm0, %v348_v55 }
  0x62   : > { %1154 = vmatprep.mubr.msk.f32.mxu0 %vm375_vm0, %v349_v56 }
  0x65   : > { %1155 = vmatmul.mubr.msk.f32.gmra.mrb[4].mxu0 %vm375_vm0, %v349_v56 }
  0x66   : > { %1156 = vmatprep.mubr.msk.f32.mxu0 %vm375_vm0, %v350_v57 }
  0x69   : > { %1157 = vmatmul.mubr.msk.f32.gmra.mrb[6].mxu0 %vm375_vm0, %v350_v57 }
  0x8f   : > { %v358_v60 = vpop.permute.xlu0 %357 }
  0x90   : > { %v368_v10 = vpop.permute.xlu1 %367 }
  0x93   : > { %v363_v63 = vpop.permute.xlu0 %362 }
  0x94   : > { %v373_v21 = vpop.permute.xlu1 %372 }
  0x98   : > { %v587_v38 = vpop.permute.xlu0 %586 }
  0x99   : > { %v591_v41 = vpop.permute.xlu1 %590 }
  0x9c   : > { %v599_v53 = vpop.permute.xlu0 %598 }
  0x9d   : > { %v595_v4 = vpop.permute.xlu1 %594 }
 0x130   : > { %v550_v61 = vpop.f32.mrb[0].mxu0 }
 0x131   : > { %v552_v62 = vpop.f32.mrb[1].mxu0  ;;  %v551_v0 = vadd.f32 %v550_v61, %v358_v60 }
 0x132   : > { %v553_v6 = vadd.f32 %v552_v62, %v358_v60 }
 0x133   : > { %v573_v12 = vmax.f32 %v551_v0, 0.0 }
 0x134   : > { %v556_v7 = vpop.f32.mrb[2].mxu0  ;;  %v574_v14 = vmax.f32 %v553_v6, 0.0 }
 0x135   : > { %v557_v8 = vadd.f32 %v556_v7, %v363_v63  ;;  %v558_v9 = vpop.f32.mrb[3].mxu0  ;;  %v1101_v7 = vld [vmem:[%s1717_s2 + $0x20] sm:$0xff] }
 0x136   : > { %v559_v11 = vadd.f32 %v558_v9, %v363_v63  ;;  %v1103_v9 = vld [vmem:[%s1717_s2 + $0x30] sm:$0xff] }
 0x137   : > { %v575_v13 = vmax.f32 %v557_v8, 0.0  ;;  %v1102_v8 = vld [vmem:[%s1717_s2 + $0x28] sm:$0xff] }
 0x138   : > { %v576_v15 = vmax.f32 %v559_v11, 0.0  ;;  %v562_v16 = vpop.f32.mrb[4].mxu0  ;;  %v842_v11 = vld [vmem:[%s313_s11] sm:$0x3]  ;;  %s1300_s11 = sshll.u32 %s1380_s24, 4  ;;  %s1301_s11 = int_to_ptr.vmem [resolvable:$false] %s1300_s11 }
 0x139   : > { %v564_v17 = vpop.f32.mrb[5].mxu0  ;;  %v1208_v18 = vpack.c.bf16 %v575_v13, %v573_v12  ;;  %v563_v20 = vadd.f32 %v562_v16, %v368_v10  ;;  %845 = vperm.xlu0 %1295, %v842_v11   ;;  %v718_v12 = vpop.permute.xlu1 %717  ;;  %s1302_s12 = scalar_lea.vmem %s1301_s11, 128  ;;  %p1303_p1 = scmp.lt.s32.totalorder %s1670_s20, %s1301_s11 }
 0x13a   : > { %v1206_v19 = vpack.c.bf16 %v576_v15, %v574_v14  ;;  %v565_v22 = vadd.f32 %v564_v17, %v368_v10  ;;  %v1104_v10 = vld [vmem:[%s1717_s2 + $0x38] sm:$0xff]  ;;  %v722_v15 = vpop.permute.xlu0 %721  ;;  %p1304_p2 = scmp.lt.s32.totalorder %s1302_s12, %s1296_s8 }
 0x13b   : > { %v577_v27 = vmax.f32 %v563_v20, 0.0 }
 0x13c   : > { %v568_v23 = vpop.f32.mrb[6].mxu0  ;;  %1207 = vmatprep.subr.bf16.mxu1 %v1206_v19  ;;  %v578_v29 = vmax.f32 %v565_v22, 0.0  ;;  %p1305_p3 = por %p1304_p2, %p1303_p1 }
 0x13d   : > { %v569_v24 = vadd.f32 %v568_v23, %v373_v21  ;;  %v570_v25 = vpop.f32.mrb[7].mxu0  ;;  %1209 = vmatpush1.bf16.msra.mxu1 %v1208_v18 }
 0x13e   : > { %v571_v26 = vadd.f32 %v570_v25, %v373_v21  ;;  %v726_v21 = vpop.permute.xlu1 %725  ;;  %p1306_p5 = pnand %p1305_p3, %p1299_p0 }
 0x13f   : > { %v579_v28 = vmax.f32 %v569_v24, 0.0 }
 0x140   : > { %v580_v30 = vmax.f32 %v571_v26, 0.0 }
 0x141   : > { %v1212_v31 = vpack.c.bf16 %v579_v28, %v577_v27 }
 0x142   : > { %v1210_v32 = vpack.c.bf16 %v580_v30, %v578_v29 }
 0x144   : > { %1211 = vmatprep.subr.bf16.mxu1 %v1210_v32 }
 0x145   : > { %1213 = vmatpush1.bf16.msra.mxu1 %v1212_v31  ;;  %v730_v31 = vpop.permute.xlu1 %729 }
 0x148   : > { %1097 = vmatmul.mubr.msk.f32.vlgmr.msra.gmra.mrb[0].mxu1 %vm601_vm2, %v581_v33 }
 0x149   : > { %684 = vmatprep.mubr.f32.mxu1 %v1377_v58 }
 0x14c   : > { %1098 = vmatmul.mubr.msk.f32.gmra.mrb[2].mxu1 %vm601_vm2, %v582_v34 }
 0x14d   : > { %690 = vmatprep.mubr.f32.mxu1 %v1377_v58 }
 0x150   : > { %1099 = vmatmul.mubr.msk.f32.gmra.mrb[4].mxu1 %vm601_vm2, %v583_v35 }
 0x151   : > { %696 = vmatprep.mubr.f32.mxu1 %v1377_v58 }
 0x154   : > { %1100 = vmatmul.mubr.msk.f32.gmra.mrb[6].mxu1 %vm601_vm2, %v584_v36 }
 0x155   : > { %808 = vmatprep.mubr.f32.mxu1 %v1377_v58 }
 0x21b   : > { %v680_v39 = vpop.f32.mrb[0].mxu1 }
 0x21c   : > { %v682_v40 = vpop.f32.mrb[1].mxu1  ;;  %v681_v42 = vadd.f32 %v680_v39, %v587_v38 }
 0x21d   : > { %v683_v43 = vadd.f32 %v682_v40, %v587_v38 }
 0x21e   : > { %v703_v48 = vmax.f32 %v681_v42, 0.0 }
 0x21f   : > { %v686_v44 = vpop.f32.mrb[2].mxu1  ;;  %v704_v49 = vmax.f32 %v683_v43, 0.0  ;;  %v841_v43 = vld [vmem:[%s309_s14] sm:$0x3] }
 0x220   : > { %v687_v45 = vadd.f32 %v686_v44, %v591_v41  ;;  %v688_v46 = vpop.f32.mrb[3].mxu1  ;;  %v846_v44 = vpop.permute.xlu0 %845 }
 0x221   : > { %v689_v47 = vadd.f32 %v688_v46, %v591_v41 }
 0x222   : > { %v705_v2 = vmax.f32 %v687_v45, 0.0 }
 0x223   : > { %v706_v50 = vmax.f32 %v689_v47, 0.0  ;;  %v692_v3 = vpop.f32.mrb[4].mxu1 }
 0x224   : > { %v1216_v51 = vpack.c.bf16 %v705_v2, %v703_v48  ;;  %v694_v1 = vpop.f32.mrb[5].mxu1  ;;  %v693_v5 = vadd.f32 %v692_v3, %v595_v4 }
 0x225   : > { %v1214_v52 = vpack.c.bf16 %v706_v50, %v704_v49  ;;  %v695_v54 = vadd.f32 %v694_v1, %v595_v4 }
 0x226   : > { %v707_v60 = vmax.f32 %v693_v5, 0.0 }
 0x227   : > { %v698_v55 = vpop.f32.mrb[6].mxu1  ;;  %1215 = vmatprep.subr.bf16.mxu1 %v1214_v52  ;;  %v708_v62 = vmax.f32 %v695_v54, 0.0 }
 0x228   : > { %v699_v56 = vadd.f32 %v698_v55, %v599_v53  ;;  %v700_v57 = vpop.f32.mrb[7].mxu1  ;;  %1217 = vmatpush1.bf16.msra.mxu1 %v1216_v51 }
 0x229   : > { %v701_v59 = vadd.f32 %v700_v57, %v599_v53 }
 0x22a   : > { %v709_v61 = vmax.f32 %v699_v56, 0.0 }
 0x22b   : > { %v710_v63 = vmax.f32 %v701_v59, 0.0 }
 0x22c   : > { %v1220_v0 = vpack.c.bf16 %v709_v61, %v707_v60 }
 0x22d   : > { %v1218_v6 = vpack.c.bf16 %v710_v63, %v708_v62 }
 0x22f   : > { %1219 = vmatprep.subr.bf16.mxu1 %v1218_v6 }
 0x230   : > { %1221 = vmatpush1.bf16.msra.mxu1 %v1220_v0 }
 0x233   : > { %1105 = vmatmul.mubr.msk.f32.vlgmr.msra.gmra.mrb[8].mxu1 %vm601_vm2, %v1101_v7 }
 0x234   : > { %814 = vmatprep.mubr.f32.mxu1 %v1377_v58 }
 0x237   : > { %1106 = vmatmul.mubr.msk.f32.gmra.mrb[10].mxu1 %vm601_vm2, %v1102_v8 }
 0x238   : > { %820 = vmatprep.mubr.f32.mxu1 %v1377_v58 }
 0x23b   : > { %1107 = vmatmul.mubr.msk.f32.gmra.mrb[12].mxu1 %vm601_vm2, %v1103_v9 }
 0x23c   : > { %826 = vmatprep.mubr.f32.mxu1 %v1377_v58 }
 0x23f   : > { %1108 = vmatmul.mubr.msk.f32.gmra.mrb[14].mxu1 %vm601_vm2, %v1104_v10 }
 0x240   : > { %915 = vmatprep.mubr.f32.mxu1 %v1377_v58 }
 0x306   : > { %v810_v13 = vpop.f32.mrb[8].mxu1 }
 0x307   : > { %v812_v14 = vpop.f32.mrb[9].mxu1  ;;  %v811_v16 = vadd.f32 %v810_v13, %v718_v12 }
 0x308   : > { %v813_v17 = vadd.f32 %v812_v14, %v718_v12 }
 0x309   : > { %v833_v58 = vmax.f32 %v811_v16, 0.0 }
 0x30a   : > { %v816_v18 = vpop.f32.mrb[10].mxu1  ;;  %v834_v24 = vmax.f32 %v813_v17, 0.0 }
 0x30b   : > { %v817_v19 = vadd.f32 %v816_v18, %v722_v15  ;;  %v818_v20 = vpop.f32.mrb[11].mxu1 }
 0x30c   : > { %v819_v22 = vadd.f32 %v818_v20, %v722_v15 }
 0x30d   : > { %v835_v23 = vmax.f32 %v817_v19, 0.0 }
 0x30e   : > { %v836_v25 = vmax.f32 %v819_v22, 0.0  ;;  %v822_v26 = vpop.f32.mrb[12].mxu1 }
 0x30f   : > { %v1224_v27 = vpack.c.bf16 %v835_v23, %v833_v58  ;;  %v824_v28 = vpop.f32.mrb[13].mxu1  ;;  %v823_v30 = vadd.f32 %v822_v26, %v726_v21 }
 0x310   : > { %v1222_v29 = vpack.c.bf16 %v836_v25, %v834_v24  ;;  %v825_v32 = vadd.f32 %v824_v28, %v726_v21 }
 0x311   : > { %v837_v37 = vmax.f32 %v823_v30, 0.0 }
 0x312   : > { %v828_v33 = vpop.f32.mrb[14].mxu1  ;;  %1223 = vmatprep.subr.bf16.mxu1 %v1222_v29  ;;  %v838_v39 = vmax.f32 %v825_v32, 0.0 }
 0x313   : > { %v829_v34 = vadd.f32 %v828_v33, %v730_v31  ;;  %v830_v35 = vpop.f32.mrb[15].mxu1  ;;  %1225 = vmatpush1.bf16.msra.mxu1 %v1224_v27 }
 0x314   : > { %v831_v36 = vadd.f32 %v830_v35, %v730_v31 }
 0x315   : > { %v839_v38 = vmax.f32 %v829_v34, 0.0 }
 0x316   : > { %v840_v40 = vmax.f32 %v831_v36, 0.0 }
 0x317   : > { %v1228_v41 = vpack.c.bf16 %v839_v38, %v837_v37 }
 0x318   : > { %v1226_v42 = vpack.c.bf16 %v840_v40, %v838_v39 }
 0x31a   : > { %1227 = vmatprep.subr.bf16.mxu1 %v1226_v42 }
 0x31b   : > { %1229 = vmatpush1.bf16.msra.mxu1 %v1228_v41 }
 0x31e   : > { %1109 = vmatmul.mubr.msk.f32.vlgmr.msra.gmra.mrb[16].mxu1 %vm601_vm2, %v841_v43 }
 0x3f1   : > { %v917_v45 = vpop.f32.mrb[16].mxu1 }
 0x3f2   : > { %v918_v46 = vadd.f32 %v917_v45, %v846_v44  ;;  %v919_v47 = vpop.f32.mrb[17].mxu1 }
 0x3f3   : > { %v920_v48 = vadd.f32 %v919_v47, %v846_v44 }
 0x3f5   : > { %v924_v2 = vcombine.low %v918_v46, %v920_v48 }
 0x3f7   : > { %1110 = vst.sshfl [vmem:[%s295_s19] sm:$0x33 pattern:$0x76325410] %v924_v2 }
 0x3f8   : > { %1309 = shalt.err (!%p1306_p5)
}
 0x3f9   : > { %s1310_s13 = scalar_lea.hbm %s1668_s28, 64  ;;  %s1314_s17 = scalar_lea.hbm %s1721_s6, 128 }
 0x3fa   : > { %p1311_p6 = scmp.ne.s32.totalorder %s1668_s28, %s1310_s13  ;;  %p1315_p10 = scmp.lt.u32.totalorder %s1668_s28, %s1721_s6 }
 0x3fb   : > { %p1316_p11 = scmp.lt.u32.totalorder %s1314_s17, %s1310_s13  ;;  %p1318_p13 = scmp.lt.u32.totalorder %s1310_s13, %s1668_s28 }
 0x3fc   : > { %p1312_p7 = pnand %p1311_p6, %p1456_p4 }
 0x3fd   : > { %p1317_p12 = por %p1316_p11, %p1315_p10 }
 0x3fe   : > { %p1313_p9 = pneg %p1312_p7 }
 0x3ff   : > { %p1319_p0 = por %p1318_p13, %p1317_p12 }
 0x401   : > { %p1320_p1 = pnand %p1319_p0, %p1313_p9 }
 0x403   : > { %1323 = shalt.err (!%p1320_p1)
}
 0x404   : > { %1230 = dma.vmem_to_hbm [thread:$0]  (%p1456_p4), %s1670_s20, 64, %s1668_s28, %s935_s30  }
 0x405 PF: > { %p1236_p2 = scmp.ge.s32.totalorder %s1374_s26, 2  ;;  %s963_s15 = sand.u32 1, %s1354_s21  }
 0x406   : > { %s964_s27 = scalar_lea.sflag [#allocation3], %s963_s15 }
 0x407   : > { %p1233_p3 = pnand %p1236_p2, %p1463_p8 }
 0x409   : > { %1349 = dma.done.wait (!%p1233_p3), %s964_s27, 64  }
 0x40a   : > { %1351 = vsyncadd (!%p1233_p3), %s964_s27, 4294967232  ;;  %s19_s26 = sadd.s32 1, %s1374_s26   ;;  %s1726_s21 = smov %s1358_s22 }
 0x40b   : > { %p16_p5 = scmp.ge.s32.totalorder %s19_s26, 4   ;;  %s1727_s22 = smov %s1362_s23 }
 0x40c   : > { %s1728_s23 = smov %s1469_s10  ;;  %s1729_s24 = smov %s1370_s25 }
 0x40d   : > { %s1730_s25 = smov %s1732_s29  ;;  %18 = sbr.rel (!%p16_p5) target bundleno = 4 (0x4), region = 86 }
 0x414   :  { %969 = vsyncpa [#allocation3], 1 }
 0x415   :  { %971 = vsyncpa [#allocation3 + $0x1], 1 }

</bundles_post_ra>
